<compile_context>
chip_gen: v7x
topology: tpu7x:2x2x1
jax: 0.10.0
libtpu: 0.0.40
codegen_flags: <defaults>
</compile_context>

<pallas_src>
import functools
from dataclasses import dataclass, field
from typing import Any, Dict, List, Optional, Tuple

import jax
import jax.numpy as jnp
from jax.experimental import pallas as pl
from jax.experimental.pallas import tpu as pltpu


# ----------------------------------------------------------------------------
# Pallas kernel: dense preproc (x @ W + b, ReLU), tiled matmul with accumulator.
# ----------------------------------------------------------------------------
def _dense_preproc_kernel(x_ref, w_ref, b_ref, o_ref, acc_ref):
    k = pl.program_id(2)

    @pl.when(k == 0)
    def _init():
        acc_ref[...] = jnp.zeros_like(acc_ref)

    # bf16 x bf16 -> f32 accumulate on the MXU.
    acc_ref[...] += jnp.dot(
        x_ref[...], w_ref[...], preferred_element_type=jnp.float32
    )

    @pl.when(k == pl.num_programs(2) - 1)
    def _finalize():
        # Bias-add + ReLU fused into the last K step (stays in VMEM).
        o_ref[...] = jnp.maximum(acc_ref[...] + b_ref[...], 0.0).astype(o_ref.dtype)


def _round_up(x: int, m: int) -> int:
    return ((x + m - 1) // m) * m


@functools.partial(jax.jit, static_argnames=("tm", "tn", "tk"))
def dense_preproc_pallas(
    x: jax.Array,
    w: jax.Array,
    b: jax.Array,
    *,
    tm: int = 128,
    tn: int = 128,
    tk: int = 256,
) -> jax.Array:
    """x: [B, Din], w: [Din, Dout], b: [1, Dout] (or [Dout]) -> [B, Dout] f32.

    Pads to tile-aligned, lane-dense shapes, runs the tiled Pallas kernel in bf16
    (f32 accumulation), and slices back to the logical output shape.
    """
    B, Din = x.shape
    K_in, Dout = w.shape
    assert K_in == Din

    M = _round_up(B, tm)
    K = _round_up(Din, tk)
    N = _round_up(Dout, tn)

    # bf16 operands; zero padding is exact in bf16 and contributes nothing to the dot.
    x_p = jnp.pad(x.astype(jnp.bfloat16), ((0, M - B), (0, K - Din)))
    w_p = jnp.pad(w.astype(jnp.bfloat16), ((0, K - Din), (0, N - Dout)))
    b_p = jnp.pad(b.astype(jnp.float32).reshape(1, Dout), ((0, 0), (0, N - Dout)))

    grid = (M // tm, N // tn, K // tk)  # batch outermost, reduction innermost

    cost = pl.CostEstimate(
        flops=2 * M * N * K,
        transcendentals=0,
        bytes_accessed=M * K * 2 + K * N * 2 + N * 4 + M * N * 4,
    )

    out_p = pl.pallas_call(
        _dense_preproc_kernel,
        out_shape=jax.ShapeDtypeStruct((M, N), jnp.float32),
        grid=grid,
        in_specs=[
            pl.BlockSpec((tm, tk), lambda i, j, k: (i, k)),
            # Weight index_map ignores the batch axis -> weight-stationary over batch.
            pl.BlockSpec((tk, tn), lambda i, j, k: (k, j)),
            pl.BlockSpec((1, tn), lambda i, j, k: (0, j)),
        ],
        out_specs=pl.BlockSpec((tm, tn), lambda i, j, k: (i, j)),
        scratch_shapes=[pltpu.VMEM((tm, tn), jnp.float32)],
        compiler_params=pltpu.CompilerParams(
            dimension_semantics=("parallel", "parallel", "arbitrary"),
        ),
        cost_estimate=cost,
    )(x_p, w_p, b_p)

    return out_p[:B, :Dout]


# ----------------------------------------------------------------------------
# The wrapped preproc module (JAX analogue of an nn.Module preproc), backed by
# the Pallas kernel above.
# ----------------------------------------------------------------------------
class DensePreprocModule:
    def __init__(self, hidden_in: int, hidden_out: int, key: jax.Array):
        k_w, k_b = jax.random.split(key)
        bound = 1.0 / (hidden_in ** 0.5)
        self.weight = jax.random.uniform(
            k_w, (hidden_in, hidden_out), jnp.float32, -bound, bound
        )
        self.bias = jax.random.uniform(
            k_b, (1, hidden_out), jnp.float32, -bound, bound
        )

    def __call__(self, x: jax.Array) -> jax.Array:
        return dense_preproc_pallas(x, self.weight, self.bias)


# ----------------------------------------------------------------------------
# Faithful ports of ArgInfo / TrainPipelineContext / _build_args_kwargs /
# PipelinedPreproc (glue, no tensor compute).
# ----------------------------------------------------------------------------
@dataclass
class ArgInfo:
    input_attrs: List[str]
    is_getitems: List[bool]
    preproc_modules: List[Optional["PipelinedPreproc"]]
    name: Optional[str]


@dataclass
class TrainPipelineContext:
    # TODO(synk): distributed awaitables / module_contexts / events have no Pallas
    # equivalent (host-side pipeline bookkeeping); only preproc_fwd_results is used.
    preproc_fwd_results: Dict[str, Any] = field(default_factory=dict)
    index: Optional[int] = None
    version: int = 0


def _build_args_kwargs(
    initial_input: Any, fwd_args: List[ArgInfo]
) -> Tuple[List[Any], Dict[str, Any]]:
    args = []
    kwargs = {}
    for arg_info in fwd_args:
        if arg_info.input_attrs:
            arg = initial_input
            for attr, is_getitem, preproc_mod in zip(
                arg_info.input_attrs, arg_info.is_getitems, arg_info.preproc_modules
            ):
                if preproc_mod is not None:
                    arg = preproc_mod(arg)
                elif is_getitem:
                    arg = arg[attr]
                elif attr != "":
                    arg = getattr(arg, attr)
                else:
                    arg = arg
            if arg_info.name:
                kwargs[arg_info.name] = arg
            else:
                args.append(arg)
        else:
            args.append(None)
    return (args, kwargs)


class PipelinedPreproc:
    """
    Wrapper around a preproc module for sparse-data-dist pipelining.
    forward(): return cached result if present, else extract args from input[0]
    per ArgInfo, run the preproc module (Pallas kernel), and cache by fqn.
    """

    def __init__(
        self,
        preproc_module: Any,
        fqn: str,
        args: List[ArgInfo],
        context: TrainPipelineContext,
    ) -> None:
        self._preproc_module = preproc_module
        self._fqn = fqn
        self._args = args
        self._context = context

    @property
    def preproc_module(self) -> Any:
        return self._preproc_module

    @property
    def fqn(self) -> str:
        return self._fqn

    def __call__(self, *input, **kwargs) -> Any:
        return self.forward(*input, **kwargs)

    def forward(self, *input, **kwargs) -> Any:
        if self._fqn in self._context.preproc_fwd_results:
            return self._context.preproc_fwd_results[self._fqn]
        args, kw = _build_args_kwargs(input[0], self._args)
        # TODO(synk): record_function profiling scope has no Pallas equivalent.
        res = self._preproc_module(*args, **kw)
        self._context.preproc_fwd_results[self._fqn] = res
        return res

    @property
    def args(self) -> List[ArgInfo]:
        return self._args

    def set_context(self, context: TrainPipelineContext) -> None:
        self._context = context

    def get_context(self) -> TrainPipelineContext:
        return self._context


# ----------------------------------------------------------------------------
# Demo / smoke test.
# ----------------------------------------------------------------------------
if __name__ == "__main__":
    key = jax.random.PRNGKey(0)
    k_param, k_x, k_big = jax.random.split(key, 3)

    BATCH, HIDDEN = 8, 32

    # Input batch: a dict; the ArgInfo chain pulls batch["dense_features"].
    dense_features = jax.random.normal(k_x, (BATCH, HIDDEN), jnp.float32)
    batch = {"dense_features": dense_features}

    preproc = DensePreprocModule(HIDDEN, HIDDEN, k_param)
    ctx = TrainPipelineContext(index=0)
    arg_infos = [
        ArgInfo(
            input_attrs=["dense_features"],
            is_getitems=[True],
            preproc_modules=[None],
            name=None,
        )
    ]
    pipelined = PipelinedPreproc(preproc, "model.preproc", arg_infos, ctx)

    out = pipelined(batch)
    out = jax.block_until_ready(out)

    # Check caching semantics: second call must return the memoized object.
    out2 = pipelined(batch)
    assert out2 is out

    # Correctness vs reference (reference uses the same bf16-cast operands that the
    # kernel consumes; accumulation is f32 in both).
    x_b = dense_features.astype(jnp.bfloat16).astype(jnp.float32)
    w_b = preproc.weight.astype(jnp.bfloat16).astype(jnp.float32)
    ref = jnp.maximum(x_b @ w_b + preproc.bias, 0.0)
    assert out.shape == (BATCH, HIDDEN) and out.dtype == jnp.float32
    assert jnp.allclose(out, ref, atol=1e-2, rtol=1e-2)

    # Exercise the multi-tile accumulator path (grid = (2, 2, 2)).
    Bb, Kb, Nb = 256, 512, 256
    xb = jax.random.normal(k_big, (Bb, Kb), jnp.float32)
    wb = jax.random.normal(k_param, (Kb, Nb), jnp.float32) * (1.0 / (Kb ** 0.5))
    bb = jnp.zeros((1, Nb), jnp.float32)
    out_big = jax.block_until_ready(dense_preproc_pallas(xb, wb, bb))
    ref_big = jnp.maximum(
        xb.astype(jnp.bfloat16).astype(jnp.float32)
        @ wb.astype(jnp.bfloat16).astype(jnp.float32)
        + bb,
        0.0,
    )
    assert out_big.shape == (Bb, Nb)
    assert jnp.allclose(out_big, ref_big, atol=5e-2, rtol=5e-2)

    print("KERNEL_OK")
</pallas_src>

<mosaic_0001>
module attributes {stable_mosaic.version = 11 : i64} {
  func.func @_dense_preproc_kernel(%arg0: i32, %arg1: i32, %arg2: i32, %arg3: memref<128x256xbf16, #tpu.memory_space<vmem>>, %arg4: memref<256x128xbf16, #tpu.memory_space<vmem>>, %arg5: memref<1x128xf32, #tpu.memory_space<vmem>>, %arg6: memref<128x128xf32, #tpu.memory_space<vmem>>, %arg7: memref<128x128xf32, #tpu.memory_space<vmem>>) attributes {dimension_semantics = [#tpu.dimension_semantics<parallel>, #tpu.dimension_semantics<parallel>, #tpu.dimension_semantics<arbitrary>], iteration_bounds = array<i64: 1, 1, 1>, scalar_prefetch = 0 : i64, scratch_operands = 1 : i64, tpu.core_type = #tpu.core_type<tc>, window_params = [{transform_indices = @transform_0, window_bounds = array<i64: 128, 256>}, {transform_indices = @transform_1, window_bounds = array<i64: 256, 128>}, {transform_indices = @transform_2, window_bounds = array<i64: 1, 128>}, {transform_indices = @transform_3, window_bounds = array<i64: 128, 128>}]} {
    %c0_i32 = arith.constant 0 : i32
    %0 = arith.cmpi eq, %arg2, %c0_i32 : i32
    %1 = arith.extui %0 : i1 to i32
    %c0_i32_0 = arith.constant 0 : i32
    %2 = arith.cmpi ne, %1, %c0_i32_0 : i32
    scf.if %2 {
      %cst_10 = arith.constant 0.000000e+00 : f32
      %12 = vector.broadcast %cst_10 : f32 to vector<128x128xf32>
      %c0_11 = arith.constant 0 : index
      %c0_12 = arith.constant 0 : index
      %13 = vector.load %arg7[%c0_11, %c0_12] : memref<128x128xf32, #tpu.memory_space<vmem>>, vector<128x128xf32>
      tpu.vector_store %arg7[%c0_11, %c0_12], %12 {strides = array<i32>} : memref<128x128xf32, #tpu.memory_space<vmem>>, vector<128x128xf32>,
    } else {
    }
    %c0 = arith.constant 0 : index
    %c0_1 = arith.constant 0 : index
    %3 = vector.load %arg7[%c0, %c0_1] : memref<128x128xf32, #tpu.memory_space<vmem>>, vector<128x128xf32>
    %c0_2 = arith.constant 0 : index
    %c0_3 = arith.constant 0 : index
    %4 = vector.load %arg3[%c0_2, %c0_3] : memref<128x256xbf16, #tpu.memory_space<vmem>>, vector<128x256xbf16>
    %c0_4 = arith.constant 0 : index
    %c0_5 = arith.constant 0 : index
    %5 = vector.load %arg4[%c0_4, %c0_5] : memref<256x128xbf16, #tpu.memory_space<vmem>>, vector<256x128xbf16>
    %cst = arith.constant dense<0.000000e+00> : vector<128x128xf32>
    %6 = tpu.matmul %4, %5, %cst {dimension_numbers = #tpu.dot_dimension_numbers<[1], [0], [0], [1], [0, 0, 1, 1], [], []>} : vector<128x256xbf16>, vector<256x128xbf16>, vector<128x128xf32> -> vector<128x128xf32>
    %7 = arith.addf %3, %6 : vector<128x128xf32>
    %c0_6 = arith.constant 0 : index
    %c0_7 = arith.constant 0 : index
    %8 = vector.load %arg7[%c0_6, %c0_7] : memref<128x128xf32, #tpu.memory_space<vmem>>, vector<128x128xf32>
    tpu.vector_store %arg7[%c0_6, %c0_7], %7 {strides = array<i32>} : memref<128x128xf32, #tpu.memory_space<vmem>>, vector<128x128xf32>,
    %c0_i32_8 = arith.constant 0 : i32
    %9 = arith.cmpi eq, %arg2, %c0_i32_8 : i32
    %10 = arith.extui %9 : i1 to i32
    %c0_i32_9 = arith.constant 0 : i32
    %11 = arith.cmpi ne, %10, %c0_i32_9 : i32
    scf.if %11 {
      %c0_10 = arith.constant 0 : index
      %c0_11 = arith.constant 0 : index
      %12 = vector.load %arg7[%c0_10, %c0_11] : memref<128x128xf32, #tpu.memory_space<vmem>>, vector<128x128xf32>
      %c0_12 = arith.constant 0 : index
      %c0_13 = arith.constant 0 : index
      %13 = vector.load %arg5[%c0_12, %c0_13] : memref<1x128xf32, #tpu.memory_space<vmem>>, vector<1x128xf32>
      %14 = vector.broadcast %13 : vector<1x128xf32> to vector<128x128xf32>
      %15 = arith.addf %12, %14 : vector<128x128xf32>
      %cst_14 = arith.constant 0.000000e+00 : f32
      %16 = vector.broadcast %cst_14 : f32 to vector<128x128xf32>
      %17 = arith.maximumf %15, %16 : vector<128x128xf32>
      %c0_15 = arith.constant 0 : index
      %c0_16 = arith.constant 0 : index
      %18 = vector.load %arg6[%c0_15, %c0_16] : memref<128x128xf32, #tpu.memory_space<vmem>>, vector<128x128xf32>
      tpu.vector_store %arg6[%c0_15, %c0_16], %17 {strides = array<i32>} : memref<128x128xf32, #tpu.memory_space<vmem>>, vector<128x128xf32>,
    } else {
    }
    return
  }
  func.func @transform_0(%arg0: i32, %arg1: i32, %arg2: i32) -> (i32, i32) {
    %c0_i32 = arith.constant 0 : i32
    return %arg0, %arg2 : i32, i32
  }
  func.func @transform_1(%arg0: i32, %arg1: i32, %arg2: i32) -> (i32, i32) {
    %c0_i32 = arith.constant 0 : i32
    return %arg2, %arg1 : i32, i32
  }
  func.func @transform_2(%arg0: i32, %arg1: i32, %arg2: i32) -> (i32, i32) {
    %c0_i32 = arith.constant 0 : i32
    %c0_i32_0 = arith.constant 0 : i32
    return %c0_i32, %arg1 : i32, i32
  }
  func.func @transform_3(%arg0: i32, %arg1: i32, %arg2: i32) -> (i32, i32) {
    %c0_i32 = arith.constant 0 : i32
    return %arg0, %arg1 : i32, i32
  }
}

</mosaic_0001>

<bundles_post_ra>
// kernel: dense_preproc_pallas.1
= control target key start
LH: loop header
LB: loop body
LE: loop exit
PB: predicated region body
PF: predicated region fallthrough
CT: control target
= control target key end

     0   :  { %s820_s1 = inlined_call_operand.vmem [shape: bf16[256,128], index: 1, kind: input, shape index: {}]   ;;  %s821_s0 = inlined_call_operand.vmem [shape: bf16[128,256], index: 0, kind: input, shape index: {}]   ;;  %s822_s2 = inlined_call_operand.vmem [shape: f32[1,128], index: 2, kind: input, shape index: {}]   ;;  %s823_s3 = inlined_call_operand.vmem [shape: f32[128,128], index: 3, kind: output, shape index: {}]  }
   0x1   :  { %v595_v0 = vld [vmem:[%s820_s1 + $0x40] sm:$0xff]   ;;  %v597_v2 = vld [vmem:[%s820_s1 + $0x48] sm:$0xff]   ;;  %v599_v4 = vld [vmem:[%s820_s1 + $0x50] sm:$0xff]  }
   0x2   :  { %v596_v1 = vld [vmem:[%s820_s1] sm:$0xff]   ;;  %515 = vmatprep.subr.bf16.mxu0 %v595_v0  ;;  %579 = vmatprep.subr.bf16.mxu1 %v595_v0  ;;  %v598_v3 = vld [vmem:[%s820_s1 + $0x8] sm:$0xff]   ;;  %v600_v5 = vld [vmem:[%s820_s1 + $0x10] sm:$0xff]  }
   0x3   :  { %516 = vmatpush3.bf16.msra.mxu0 %v596_v1  ;;  %587 = vmatpush3.bf16.msra.mxu1 %v596_v1  ;;  %v601_v6 = vld [vmem:[%s820_s1 + $0x58] sm:$0xff]   ;;  %v603_v8 = vld [vmem:[%s820_s1 + $0x60] sm:$0xff]   ;;  %v605_v10 = vld [vmem:[%s820_s1 + $0x68] sm:$0xff]  }
   0x4   :  { %517 = vmatprep.subr.bf16.mxu0 %v597_v2  ;;  %580 = vmatprep.subr.bf16.mxu1 %v597_v2  ;;  %v602_v7 = vld [vmem:[%s820_s1 + $0x18] sm:$0xff]   ;;  %v604_v9 = vld [vmem:[%s820_s1 + $0x20] sm:$0xff]   ;;  %v606_v13 = vld [vmem:[%s820_s1 + $0x28] sm:$0xff]  }
   0x5   :  { %v613_v11 = vld [vmem:[%s821_s0 + $0x4] ss:$8 sps:$4 sm:$0xff]   ;;  %v607_v14 = vld [vmem:[%s820_s1 + $0x70] sm:$0xff]   ;;  %v609_v16 = vld [vmem:[%s820_s1 + $0x78] sm:$0xff]  }
   0x6   :  { %v616_v12 = vld [vmem:[%s821_s0 + $0x44] ss:$8 sps:$4 sm:$0xff]   ;;  %307 = vmatprep.mubr.bf16.mxu0 %v613_v11  ;;  %v608_v15 = vld [vmem:[%s820_s1 + $0x30] sm:$0xff]   ;;  %v610_v17 = vld [vmem:[%s820_s1 + $0x38] sm:$0xff]  }
   0x7   :  { %518 = vmatpush3.bf16.msra.mxu0 %v598_v3  ;;  %588 = vmatpush3.bf16.msra.mxu1 %v598_v3  ;;  %v611_v18 = vld [vmem:[%s821_s0] ss:$8 sps:$4 sm:$0xff]   ;;  %v617_v20 = vld [vmem:[%s821_s0 + $0x14] ss:$8 sps:$4 sm:$0xff]   ;;  %v621_v22 = vld [vmem:[%s821_s0 + $0x10] ss:$8 sps:$4 sm:$0xff]  }
   0x8   :  { %519 = vmatprep.subr.bf16.mxu0 %v599_v4  ;;  %581 = vmatprep.subr.bf16.mxu1 %v599_v4  ;;  %v614_v19 = vld [vmem:[%s821_s0 + $0x40] ss:$8 sps:$4 sm:$0xff]   ;;  %v619_v21 = vld [vmem:[%s821_s0 + $0x54] ss:$8 sps:$4 sm:$0xff]   ;;  %v622_v23 = vld [vmem:[%s821_s0 + $0x50] ss:$8 sps:$4 sm:$0xff]  }
   0x9   :  { %339 = vmatprep.mubr.bf16.mxu1 %v616_v12  ;;  %v623_v24 = vld [vmem:[%s821_s0 + $0x24] ss:$8 sps:$4 sm:$0xff]   ;;  %v627_v26 = vld [vmem:[%s821_s0 + $0x20] ss:$8 sps:$4 sm:$0xff]   ;;  %v629_v28 = vld [vmem:[%s821_s0 + $0x34] ss:$8 sps:$4 sm:$0xff]  }
   0xa   :  { %v625_v25 = vld [vmem:[%s821_s0 + $0x64] ss:$8 sps:$4 sm:$0xff]   ;;  %v628_v27 = vld [vmem:[%s821_s0 + $0x60] ss:$8 sps:$4 sm:$0xff]   ;;  %v631_v29 = vld [vmem:[%s821_s0 + $0x74] ss:$8 sps:$4 sm:$0xff]  }
   0xb   :  { %520 = vmatpush3.bf16.msra.mxu0 %v600_v5  ;;  %589 = vmatpush3.bf16.msra.mxu1 %v600_v5  ;;  %v633_v30 = vld [vmem:[%s821_s0 + $0x30] ss:$8 sps:$4 sm:$0xff]   ;;  %v754_v35 = vld [vmem:[%s822_s2] ss:$0 sm:$0xff] }
   0xc   :  { %521 = vmatprep.subr.bf16.mxu0 %v601_v6  ;;  %582 = vmatprep.subr.bf16.mxu1 %v601_v6  ;;  %v634_v31 = vld [vmem:[%s821_s0 + $0x70] ss:$8 sps:$4 sm:$0xff]  }
   0xf   :  { %522 = vmatpush3.bf16.msra.mxu0 %v602_v7  ;;  %590 = vmatpush3.bf16.msra.mxu1 %v602_v7 }
  0x10   :  { %523 = vmatprep.subr.bf16.mxu0 %v603_v8  ;;  %583 = vmatprep.subr.bf16.mxu1 %v603_v8 }
  0x13   :  { %524 = vmatpush3.bf16.msra.mxu0 %v604_v9  ;;  %591 = vmatpush3.bf16.msra.mxu1 %v604_v9 }
  0x14   :  { %525 = vmatprep.subr.bf16.mxu0 %v605_v10  ;;  %584 = vmatprep.subr.bf16.mxu1 %v605_v10 }
  0x17   :  { %526 = vmatpush3.bf16.msra.mxu0 %v606_v13  ;;  %592 = vmatpush3.bf16.msra.mxu1 %v606_v13 }
  0x18   :  { %527 = vmatprep.subr.bf16.mxu0 %v607_v14  ;;  %585 = vmatprep.subr.bf16.mxu1 %v607_v14 }
  0x1b   :  { %528 = vmatpush3.bf16.msra.mxu0 %v608_v15  ;;  %593 = vmatpush3.bf16.msra.mxu1 %v608_v15 }
  0x1c   :  { %529 = vmatprep.subr.bf16.mxu0 %v609_v16  ;;  %586 = vmatprep.subr.bf16.mxu1 %v609_v16 }
  0x1f   :  { %530 = vmatpush3.bf16.msra.mxu0 %v610_v17  ;;  %594 = vmatpush3.bf16.msra.mxu1 %v610_v17 }
  0x22   :  { %308 = vmatmul.mubr.bf16.vlgmr.msra.gmra.mrb[0].mxu0 %v611_v18  ;;  %340 = vmatmul.mubr.bf16.vlgmr.msra.gmra.mrb[0].mxu1 %v614_v19 }
  0x23   :  { %315 = vmatprep.mubr.bf16.mxu0 %v617_v20  ;;  %347 = vmatprep.mubr.bf16.mxu1 %v619_v21 }
  0x2a   :  { %316 = vmatmul.mubr.bf16.gmra.mrb[4].mxu0 %v621_v22  ;;  %348 = vmatmul.mubr.bf16.gmra.mrb[4].mxu1 %v622_v23 }
  0x2b   :  { %323 = vmatprep.mubr.bf16.mxu0 %v623_v24  ;;  %355 = vmatprep.mubr.bf16.mxu1 %v625_v25 }
  0x32   :  { %324 = vmatmul.mubr.bf16.gmra.mrb[8].mxu0 %v627_v26  ;;  %356 = vmatmul.mubr.bf16.gmra.mrb[8].mxu1 %v628_v27 }
  0x33   :  { %331 = vmatprep.mubr.bf16.mxu0 %v629_v28  ;;  %363 = vmatprep.mubr.bf16.mxu1 %v631_v29 }
  0x3a   :  { %332 = vmatmul.mubr.bf16.gmra.mrb[12].mxu0 %v633_v30  ;;  %364 = vmatmul.mubr.bf16.gmra.mrb[12].mxu1 %v634_v31 }
  0xf5   :  { %v531_v32 = vpop.f32.mrb[0].mxu0  ;;  %v555_v33 = vpop.f32.mrb[0].mxu1 }
  0xf6   :  { %v532_v34 = vpop.f32.mrb[1].mxu0  ;;  %v556_v36 = vpop.f32.mrb[1].mxu1 }
  0xf7   :  { %v533_v37 = vadd.f32 %v532_v34, %v531_v32  ;;  %v557_v38 = vadd.f32 %v556_v36, %v555_v33  ;;  %v534_v39 = vpop.f32.mrb[2].mxu0  ;;  %v558_v40 = vpop.f32.mrb[2].mxu1 }
  0xf8   :  { %v535_v41 = vpop.f32.mrb[3].mxu0  ;;  %v559_v42 = vpop.f32.mrb[3].mxu1 }
  0xf9   :  { %v430_v43 = vadd.f32 %v533_v37, %v754_v35  ;;  %v438_v44 = vadd.f32 %v557_v38, %v754_v35  ;;  %v536_v45 = vadd.f32 %v535_v41, %v534_v39  ;;  %v560_v46 = vadd.f32 %v559_v42, %v558_v40 }
  0xfb   :  { %v446_v47 = vmax.f32 %v430_v43, 0.0  ;;  %v454_v48 = vmax.f32 %v438_v44, 0.0  ;;  %v431_v49 = vadd.f32 %v536_v45, %v754_v35  ;;  %v439_v50 = vadd.f32 %v560_v46, %v754_v35 }
  0xfd   :  { %462 = vst [vmem:[%s823_s3] sm:$0xff] %v446_v47  ;;  %470 = vst [vmem:[%s823_s3 + $0x40] sm:$0xff] %v454_v48  ;;  %v447_v51 = vmax.f32 %v431_v49, 0.0  ;;  %v455_v52 = vmax.f32 %v439_v50, 0.0  ;;  %v537_v53 = vpop.f32.mrb[4].mxu0  ;;  %v561_v54 = vpop.f32.mrb[4].mxu1 }
  0xfe   :  { %v538_v55 = vpop.f32.mrb[5].mxu0  ;;  %v562_v56 = vpop.f32.mrb[5].mxu1 }
  0xff   :  { %463 = vst [vmem:[%s823_s3 + $0x8] sm:$0xff] %v447_v51  ;;  %471 = vst [vmem:[%s823_s3 + $0x48] sm:$0xff] %v455_v52  ;;  %v539_v57 = vadd.f32 %v538_v55, %v537_v53  ;;  %v563_v58 = vadd.f32 %v562_v56, %v561_v54  ;;  %v540_v59 = vpop.f32.mrb[6].mxu0  ;;  %v564_v60 = vpop.f32.mrb[6].mxu1 }
 0x100   :  { %v541_v61 = vpop.f32.mrb[7].mxu0  ;;  %v565_v62 = vpop.f32.mrb[7].mxu1 }
 0x101   :  { %v432_v63 = vadd.f32 %v539_v57, %v754_v35  ;;  %v440_v0 = vadd.f32 %v563_v58, %v754_v35  ;;  %v542_v1 = vadd.f32 %v541_v61, %v540_v59  ;;  %v566_v2 = vadd.f32 %v565_v62, %v564_v60 }
 0x103   :  { %v448_v3 = vmax.f32 %v432_v63, 0.0  ;;  %v456_v4 = vmax.f32 %v440_v0, 0.0  ;;  %v433_v5 = vadd.f32 %v542_v1, %v754_v35  ;;  %v441_v6 = vadd.f32 %v566_v2, %v754_v35 }
 0x105   :  { %464 = vst [vmem:[%s823_s3 + $0x10] sm:$0xff] %v448_v3  ;;  %472 = vst [vmem:[%s823_s3 + $0x50] sm:$0xff] %v456_v4  ;;  %v449_v7 = vmax.f32 %v433_v5, 0.0  ;;  %v457_v8 = vmax.f32 %v441_v6, 0.0  ;;  %v543_v9 = vpop.f32.mrb[8].mxu0  ;;  %v567_v10 = vpop.f32.mrb[8].mxu1 }
 0x106   :  { %v544_v11 = vpop.f32.mrb[9].mxu0  ;;  %v568_v12 = vpop.f32.mrb[9].mxu1 }
 0x107   :  { %465 = vst [vmem:[%s823_s3 + $0x18] sm:$0xff] %v449_v7  ;;  %473 = vst [vmem:[%s823_s3 + $0x58] sm:$0xff] %v457_v8  ;;  %v545_v13 = vadd.f32 %v544_v11, %v543_v9  ;;  %v569_v14 = vadd.f32 %v568_v12, %v567_v10  ;;  %v546_v15 = vpop.f32.mrb[10].mxu0  ;;  %v570_v16 = vpop.f32.mrb[10].mxu1 }
 0x108   :  { %v547_v17 = vpop.f32.mrb[11].mxu0  ;;  %v571_v18 = vpop.f32.mrb[11].mxu1 }
 0x109   :  { %v434_v19 = vadd.f32 %v545_v13, %v754_v35  ;;  %v442_v20 = vadd.f32 %v569_v14, %v754_v35  ;;  %v548_v21 = vadd.f32 %v547_v17, %v546_v15  ;;  %v572_v22 = vadd.f32 %v571_v18, %v570_v16 }
 0x10b   :  { %v450_v23 = vmax.f32 %v434_v19, 0.0  ;;  %v458_v24 = vmax.f32 %v442_v20, 0.0  ;;  %v435_v25 = vadd.f32 %v548_v21, %v754_v35  ;;  %v443_v26 = vadd.f32 %v572_v22, %v754_v35 }
 0x10d   :  { %466 = vst [vmem:[%s823_s3 + $0x20] sm:$0xff] %v450_v23  ;;  %474 = vst [vmem:[%s823_s3 + $0x60] sm:$0xff] %v458_v24  ;;  %v451_v27 = vmax.f32 %v435_v25, 0.0  ;;  %v459_v28 = vmax.f32 %v443_v26, 0.0  ;;  %v549_v29 = vpop.f32.mrb[12].mxu0  ;;  %v573_v30 = vpop.f32.mrb[12].mxu1 }
 0x10e   :  { %v550_v31 = vpop.f32.mrb[13].mxu0  ;;  %v574_v32 = vpop.f32.mrb[13].mxu1 }
 0x10f   :  { %467 = vst [vmem:[%s823_s3 + $0x28] sm:$0xff] %v451_v27  ;;  %475 = vst [vmem:[%s823_s3 + $0x68] sm:$0xff] %v459_v28  ;;  %v551_v33 = vadd.f32 %v550_v31, %v549_v29  ;;  %v575_v34 = vadd.f32 %v574_v32, %v573_v30  ;;  %v552_v36 = vpop.f32.mrb[14].mxu0  ;;  %v576_v37 = vpop.f32.mrb[14].mxu1 }
 0x110   :  { %v553_v38 = vpop.f32.mrb[15].mxu0  ;;  %v577_v39 = vpop.f32.mrb[15].mxu1 }
 0x111   :  { %v436_v40 = vadd.f32 %v551_v33, %v754_v35  ;;  %v444_v41 = vadd.f32 %v575_v34, %v754_v35  ;;  %v554_v42 = vadd.f32 %v553_v38, %v552_v36  ;;  %v578_v43 = vadd.f32 %v577_v39, %v576_v37 }
 0x113   :  { %v452_v44 = vmax.f32 %v436_v40, 0.0  ;;  %v460_v45 = vmax.f32 %v444_v41, 0.0  ;;  %v437_v46 = vadd.f32 %v554_v42, %v754_v35  ;;  %v445_v47 = vadd.f32 %v578_v43, %v754_v35 }
 0x115   :  { %468 = vst [vmem:[%s823_s3 + $0x30] sm:$0xff] %v452_v44  ;;  %476 = vst [vmem:[%s823_s3 + $0x70] sm:$0xff] %v460_v45  ;;  %v453_v48 = vmax.f32 %v437_v46, 0.0  ;;  %v461_v49 = vmax.f32 %v445_v47, 0.0 }
 0x117   :  { %469 = vst [vmem:[%s823_s3 + $0x38] sm:$0xff] %v453_v48  ;;  %477 = vst [vmem:[%s823_s3 + $0x78] sm:$0xff] %v461_v49 }

</bundles_post_ra>
